<compile_context>
chip_gen: v7x
topology: tpu7x:2x2x1
jax: 0.10.0
libtpu: 0.0.40
codegen_flags: <defaults>
</compile_context>

<pallas_src>
import functools
import math

import jax
import jax.numpy as jnp
from jax.experimental import pallas as pl
from jax.experimental.pallas import tpu as pltpu

LANE = 128  # samples per row of the lane-dense activation slab

# Offsets of each layer's parameters inside the packed SMEM vector.
_W1, _B1 = 0, 5        # Linear(1 -> 5):  W1[j,0] at _W1+j,      b1[j] at _B1+j
_W2, _B2 = 10, 35      # Linear(5 -> 5):  W2[j,k] at _W2+5*j+k,  b2[j] at _B2+j
_W3, _B3 = 40, 65      # Linear(5 -> 5):  W3[j,k] at _W3+5*j+k,  b3[j] at _B3+j
_W4, _B4 = 70, 75      # Linear(5 -> 1):  W4[0,k] at _W4+k,      b4[0] at _B4
_N_SCALARS = 76


def _mlp_kernel(w_ref, x_ref, o_ref, *, strip, n_strips):
    """w_ref: (76,) f32 in SMEM.  x_ref/o_ref: (tm, 128) f32 block in VMEM.

    Every element of the block is an independent sample.  The block is
    processed in `strip`-row sublane strips so only ~10 strip-sized
    temporaries are live at once (no vreg spills).  All math is VPU
    broadcast-FMA with scalar weights read from SMEM (reads hoisted above
    the strip loop)."""
    w = [w_ref[i] for i in range(_N_SCALARS)]   # hoisted SMEM scalar reads

    def strip_body(row):
        x = x_ref[pl.ds(row, strip), :]                        # (strip, 128)

        # Layer 1: Linear(1 -> 5) + ReLU   (5 FMAs + 5 max)
        h = [jnp.maximum(x * w[_W1 + j] + w[_B1 + j], 0.0) for j in range(5)]

        # Layer 2: Linear(5 -> 5) + ReLU   (25 FMAs + 5 max)
        nxt = []
        for j in range(5):
            acc = h[0] * w[_W2 + 5 * j] + w[_B2 + j]
            for k in range(1, 5):
                acc = acc + h[k] * w[_W2 + 5 * j + k]
            nxt.append(jnp.maximum(acc, 0.0))
        h = nxt

        # Layer 3: Linear(5 -> 5) + ReLU   (25 FMAs + 5 max)
        nxt = []
        for j in range(5):
            acc = h[0] * w[_W3 + 5 * j] + w[_B3 + j]
            for k in range(1, 5):
                acc = acc + h[k] * w[_W3 + 5 * j + k]
            nxt.append(jnp.maximum(acc, 0.0))
        h = nxt

        # Layer 4: Linear(5 -> 1), no activation   (5 FMAs)
        out = h[0] * w[_W4] + w[_B4]
        for k in range(1, 5):
            out = out + h[k] * w[_W4 + k]

        o_ref[pl.ds(row, strip), :] = out.astype(o_ref.dtype)

    if n_strips == 1:
        strip_body(0)
    else:
        def body(s, carry):
            strip_body(pl.multiple_of(s * strip, strip))
            return carry
        jax.lax.fori_loop(0, n_strips, body, 0)


def pack_params(params):
    """Flatten the four (W, b) pairs (PyTorch layout W:(out,in), b:(out,))
    into one 76-element f32 vector matching the SMEM offsets above.
    Do this ONCE per parameter set, not per call."""
    (W1, b1), (W2, b2), (W3, b3), (W4, b4) = params
    flat = jnp.concatenate([
        W1.reshape(-1), b1.reshape(-1),   # 5 + 5
        W2.reshape(-1), b2.reshape(-1),   # 25 + 5
        W3.reshape(-1), b3.reshape(-1),   # 25 + 5
        W4.reshape(-1), b4.reshape(-1),   # 5 + 1
    ]).astype(jnp.float32)
    assert flat.shape == (_N_SCALARS,)
    return flat


def _round_up(a, b):
    return -(-a // b) * b


def sine_model_forward(x, w_packed, *, tm_max=2048):
    """x: (N, 1) float32.  w_packed: (76,) float32 from pack_params().
    Returns (N, 1) float32."""
    N = x.shape[0]

    # Batch on the lane axis: (N,1) -> (rows, 128).  Only the <128-element
    # tail is padded (free bitcast reshape when N is already 128-aligned).
    rows = _round_up(N, LANE) // LANE
    x_flat = x.reshape(-1).astype(jnp.float32)
    pad = rows * LANE - N
    if pad:
        x_flat = jnp.pad(x_flat, (0, pad))
    x2d = x_flat.reshape(rows, LANE)

    # Rows per grid step: multiple of 8, capped at tm_max, and small enough
    # that the grid has >= 2 steps when possible (v7x megacore sharding).
    tm_max = max(8, (int(tm_max) // 8) * 8)
    tm = max(8, min(tm_max, _round_up(pl.cdiv(rows, 2), 8)))
    n_blocks = pl.cdiv(rows, tm)      # ragged final block handled by Pallas

    # In-kernel sublane strip: largest of 32/16/8 rows dividing tm.
    strip = next(s for s in (32, 16, 8) if tm % s == 0)
    n_strips = tm // strip

    out2d = pl.pallas_call(
        functools.partial(_mlp_kernel, strip=strip, n_strips=n_strips),
        out_shape=jax.ShapeDtypeStruct((rows, LANE), jnp.float32),
        grid=(n_blocks,),
        in_specs=[
            # 76 weight/bias scalars live in SMEM (no 128x128 weight padding).
            pl.BlockSpec(memory_space=pltpu.MemorySpace.SMEM),
            # lane-dense batch tiles, pipelined over the grid
            pl.BlockSpec((tm, LANE), lambda i: (i, 0)),
        ],
        out_specs=pl.BlockSpec((tm, LANE), lambda i: (i, 0)),
        compiler_params=pltpu.CompilerParams(
            dimension_semantics=("parallel",),   # batch tiles are independent
            vmem_limit_bytes=32 * 1024 * 1024,   # explicit, safe on v5e/v6e/v7x
        ),
    )(w_packed, x2d)

    out_flat = out2d.reshape(-1)
    if pad:
        out_flat = out_flat[:N]
    return out_flat.reshape(N, 1)


def init_params(key):
    """Deterministic init matching nn.Linear default: U(-1/sqrt(in), 1/sqrt(in))."""
    dims = [(1, 5), (5, 5), (5, 5), (5, 1)]  # (in, out) per layer
    params = []
    for (fan_in, fan_out) in dims:
        key, kw, kb = jax.random.split(key, 3)
        bound = 1.0 / math.sqrt(fan_in)
        W = jax.random.uniform(kw, (fan_out, fan_in), jnp.float32, -bound, bound)
        b = jax.random.uniform(kb, (fan_out,), jnp.float32, -bound, bound)
        params.append((W, b))
    return params


def reference_forward(x, params):
    h = x
    for i, (W, b) in enumerate(params):
        h = jnp.dot(h, W.T, precision=jax.lax.Precision.HIGHEST) + b
        if i < len(params) - 1:
            h = jnp.maximum(h, 0.0)
    return h


if __name__ == "__main__":
    key = jax.random.PRNGKey(0)
    k_x, k_p = jax.random.split(key)

    N = 1200  # matches M in the PyTorch spec; exercises the ragged tail + 2-step grid
    x = jax.random.uniform(k_x, (N, 1), jnp.float32) * 2.0 * math.pi

    params = init_params(k_p)
    w_packed = pack_params(params)  # packed once, not per call

    out = sine_model_forward(x, w_packed)
    out = jax.block_until_ready(out)

    ref = reference_forward(x, params)
    assert out.shape == (N, 1)
    assert jnp.allclose(out, ref, atol=1e-5, rtol=1e-4), "mismatch vs reference"

    print("KERNEL_OK")
</pallas_src>

<mosaic_0001>
module attributes {stable_mosaic.version = 11 : i64} {
  func.func @_mlp_kernel(%arg0: i32, %arg1: memref<76xf32, #tpu.memory_space<smem>>, %arg2: memref<8x128xf32, #tpu.memory_space<vmem>>, %arg3: memref<8x128xf32, #tpu.memory_space<vmem>>) attributes {dimension_semantics = [#tpu.dimension_semantics<parallel>], iteration_bounds = array<i64: 2>, scalar_prefetch = 0 : i64, scratch_operands = 0 : i64, tpu.core_type = #tpu.core_type<tc>, window_params = [{transform_indices = @transform_0, window_bounds = array<i64: 76>}, {transform_indices = @transform_1, window_bounds = array<i64: 8, 128>}, {transform_indices = @transform_2, window_bounds = array<i64: 8, 128>}]} {
    %c0 = arith.constant 0 : index
    %0 = memref.load %arg1[%c0] : memref<76xf32, #tpu.memory_space<smem>>
    %c1 = arith.constant 1 : index
    %1 = memref.load %arg1[%c1] : memref<76xf32, #tpu.memory_space<smem>>
    %c2 = arith.constant 2 : index
    %2 = memref.load %arg1[%c2] : memref<76xf32, #tpu.memory_space<smem>>
    %c3 = arith.constant 3 : index
    %3 = memref.load %arg1[%c3] : memref<76xf32, #tpu.memory_space<smem>>
    %c4 = arith.constant 4 : index
    %4 = memref.load %arg1[%c4] : memref<76xf32, #tpu.memory_space<smem>>
    %c5 = arith.constant 5 : index
    %5 = memref.load %arg1[%c5] : memref<76xf32, #tpu.memory_space<smem>>
    %c6 = arith.constant 6 : index
    %6 = memref.load %arg1[%c6] : memref<76xf32, #tpu.memory_space<smem>>
    %c7 = arith.constant 7 : index
    %7 = memref.load %arg1[%c7] : memref<76xf32, #tpu.memory_space<smem>>
    %c8 = arith.constant 8 : index
    %8 = memref.load %arg1[%c8] : memref<76xf32, #tpu.memory_space<smem>>
    %c9 = arith.constant 9 : index
    %9 = memref.load %arg1[%c9] : memref<76xf32, #tpu.memory_space<smem>>
    %c10 = arith.constant 10 : index
    %10 = memref.load %arg1[%c10] : memref<76xf32, #tpu.memory_space<smem>>
    %c11 = arith.constant 11 : index
    %11 = memref.load %arg1[%c11] : memref<76xf32, #tpu.memory_space<smem>>
    %c12 = arith.constant 12 : index
    %12 = memref.load %arg1[%c12] : memref<76xf32, #tpu.memory_space<smem>>
    %c13 = arith.constant 13 : index
    %13 = memref.load %arg1[%c13] : memref<76xf32, #tpu.memory_space<smem>>
    %c14 = arith.constant 14 : index
    %14 = memref.load %arg1[%c14] : memref<76xf32, #tpu.memory_space<smem>>
    %c15 = arith.constant 15 : index
    %15 = memref.load %arg1[%c15] : memref<76xf32, #tpu.memory_space<smem>>
    %c16 = arith.constant 16 : index
    %16 = memref.load %arg1[%c16] : memref<76xf32, #tpu.memory_space<smem>>
    %c17 = arith.constant 17 : index
    %17 = memref.load %arg1[%c17] : memref<76xf32, #tpu.memory_space<smem>>
    %c18 = arith.constant 18 : index
    %18 = memref.load %arg1[%c18] : memref<76xf32, #tpu.memory_space<smem>>
    %c19 = arith.constant 19 : index
    %19 = memref.load %arg1[%c19] : memref<76xf32, #tpu.memory_space<smem>>
    %c20 = arith.constant 20 : index
    %20 = memref.load %arg1[%c20] : memref<76xf32, #tpu.memory_space<smem>>
    %c21 = arith.constant 21 : index
    %21 = memref.load %arg1[%c21] : memref<76xf32, #tpu.memory_space<smem>>
    %c22 = arith.constant 22 : index
    %22 = memref.load %arg1[%c22] : memref<76xf32, #tpu.memory_space<smem>>
    %c23 = arith.constant 23 : index
    %23 = memref.load %arg1[%c23] : memref<76xf32, #tpu.memory_space<smem>>
    %c24 = arith.constant 24 : index
    %24 = memref.load %arg1[%c24] : memref<76xf32, #tpu.memory_space<smem>>
    %c25 = arith.constant 25 : index
    %25 = memref.load %arg1[%c25] : memref<76xf32, #tpu.memory_space<smem>>
    %c26 = arith.constant 26 : index
    %26 = memref.load %arg1[%c26] : memref<76xf32, #tpu.memory_space<smem>>
    %c27 = arith.constant 27 : index
    %27 = memref.load %arg1[%c27] : memref<76xf32, #tpu.memory_space<smem>>
    %c28 = arith.constant 28 : index
    %28 = memref.load %arg1[%c28] : memref<76xf32, #tpu.memory_space<smem>>
    %c29 = arith.constant 29 : index
    %29 = memref.load %arg1[%c29] : memref<76xf32, #tpu.memory_space<smem>>
    %c30 = arith.constant 30 : index
    %30 = memref.load %arg1[%c30] : memref<76xf32, #tpu.memory_space<smem>>
    %c31 = arith.constant 31 : index
    %31 = memref.load %arg1[%c31] : memref<76xf32, #tpu.memory_space<smem>>
    %c32 = arith.constant 32 : index
    %32 = memref.load %arg1[%c32] : memref<76xf32, #tpu.memory_space<smem>>
    %c33 = arith.constant 33 : index
    %33 = memref.load %arg1[%c33] : memref<76xf32, #tpu.memory_space<smem>>
    %c34 = arith.constant 34 : index
    %34 = memref.load %arg1[%c34] : memref<76xf32, #tpu.memory_space<smem>>
    %c35 = arith.constant 35 : index
    %35 = memref.load %arg1[%c35] : memref<76xf32, #tpu.memory_space<smem>>
    %c36 = arith.constant 36 : index
    %36 = memref.load %arg1[%c36] : memref<76xf32, #tpu.memory_space<smem>>
    %c37 = arith.constant 37 : index
    %37 = memref.load %arg1[%c37] : memref<76xf32, #tpu.memory_space<smem>>
    %c38 = arith.constant 38 : index
    %38 = memref.load %arg1[%c38] : memref<76xf32, #tpu.memory_space<smem>>
    %c39 = arith.constant 39 : index
    %39 = memref.load %arg1[%c39] : memref<76xf32, #tpu.memory_space<smem>>
    %c40 = arith.constant 40 : index
    %40 = memref.load %arg1[%c40] : memref<76xf32, #tpu.memory_space<smem>>
    %c41 = arith.constant 41 : index
    %41 = memref.load %arg1[%c41] : memref<76xf32, #tpu.memory_space<smem>>
    %c42 = arith.constant 42 : index
    %42 = memref.load %arg1[%c42] : memref<76xf32, #tpu.memory_space<smem>>
    %c43 = arith.constant 43 : index
    %43 = memref.load %arg1[%c43] : memref<76xf32, #tpu.memory_space<smem>>
    %c44 = arith.constant 44 : index
    %44 = memref.load %arg1[%c44] : memref<76xf32, #tpu.memory_space<smem>>
    %c45 = arith.constant 45 : index
    %45 = memref.load %arg1[%c45] : memref<76xf32, #tpu.memory_space<smem>>
    %c46 = arith.constant 46 : index
    %46 = memref.load %arg1[%c46] : memref<76xf32, #tpu.memory_space<smem>>
    %c47 = arith.constant 47 : index
    %47 = memref.load %arg1[%c47] : memref<76xf32, #tpu.memory_space<smem>>
    %c48 = arith.constant 48 : index
    %48 = memref.load %arg1[%c48] : memref<76xf32, #tpu.memory_space<smem>>
    %c49 = arith.constant 49 : index
    %49 = memref.load %arg1[%c49] : memref<76xf32, #tpu.memory_space<smem>>
    %c50 = arith.constant 50 : index
    %50 = memref.load %arg1[%c50] : memref<76xf32, #tpu.memory_space<smem>>
    %c51 = arith.constant 51 : index
    %51 = memref.load %arg1[%c51] : memref<76xf32, #tpu.memory_space<smem>>
    %c52 = arith.constant 52 : index
    %52 = memref.load %arg1[%c52] : memref<76xf32, #tpu.memory_space<smem>>
    %c53 = arith.constant 53 : index
    %53 = memref.load %arg1[%c53] : memref<76xf32, #tpu.memory_space<smem>>
    %c54 = arith.constant 54 : index
    %54 = memref.load %arg1[%c54] : memref<76xf32, #tpu.memory_space<smem>>
    %c55 = arith.constant 55 : index
    %55 = memref.load %arg1[%c55] : memref<76xf32, #tpu.memory_space<smem>>
    %c56 = arith.constant 56 : index
    %56 = memref.load %arg1[%c56] : memref<76xf32, #tpu.memory_space<smem>>
    %c57 = arith.constant 57 : index
    %57 = memref.load %arg1[%c57] : memref<76xf32, #tpu.memory_space<smem>>
    %c58 = arith.constant 58 : index
    %58 = memref.load %arg1[%c58] : memref<76xf32, #tpu.memory_space<smem>>
    %c59 = arith.constant 59 : index
    %59 = memref.load %arg1[%c59] : memref<76xf32, #tpu.memory_space<smem>>
    %c60 = arith.constant 60 : index
    %60 = memref.load %arg1[%c60] : memref<76xf32, #tpu.memory_space<smem>>
    %c61 = arith.constant 61 : index
    %61 = memref.load %arg1[%c61] : memref<76xf32, #tpu.memory_space<smem>>
    %c62 = arith.constant 62 : index
    %62 = memref.load %arg1[%c62] : memref<76xf32, #tpu.memory_space<smem>>
    %c63 = arith.constant 63 : index
    %63 = memref.load %arg1[%c63] : memref<76xf32, #tpu.memory_space<smem>>
    %c64 = arith.constant 64 : index
    %64 = memref.load %arg1[%c64] : memref<76xf32, #tpu.memory_space<smem>>
    %c65 = arith.constant 65 : index
    %65 = memref.load %arg1[%c65] : memref<76xf32, #tpu.memory_space<smem>>
    %c66 = arith.constant 66 : index
    %66 = memref.load %arg1[%c66] : memref<76xf32, #tpu.memory_space<smem>>
    %c67 = arith.constant 67 : index
    %67 = memref.load %arg1[%c67] : memref<76xf32, #tpu.memory_space<smem>>
    %c68 = arith.constant 68 : index
    %68 = memref.load %arg1[%c68] : memref<76xf32, #tpu.memory_space<smem>>
    %c69 = arith.constant 69 : index
    %69 = memref.load %arg1[%c69] : memref<76xf32, #tpu.memory_space<smem>>
    %c70 = arith.constant 70 : index
    %70 = memref.load %arg1[%c70] : memref<76xf32, #tpu.memory_space<smem>>
    %c71 = arith.constant 71 : index
    %71 = memref.load %arg1[%c71] : memref<76xf32, #tpu.memory_space<smem>>
    %c72 = arith.constant 72 : index
    %72 = memref.load %arg1[%c72] : memref<76xf32, #tpu.memory_space<smem>>
    %c73 = arith.constant 73 : index
    %73 = memref.load %arg1[%c73] : memref<76xf32, #tpu.memory_space<smem>>
    %c74 = arith.constant 74 : index
    %74 = memref.load %arg1[%c74] : memref<76xf32, #tpu.memory_space<smem>>
    %c75 = arith.constant 75 : index
    %75 = memref.load %arg1[%c75] : memref<76xf32, #tpu.memory_space<smem>>
    %c0_0 = arith.constant 0 : index
    %c0_1 = arith.constant 0 : index
    %76 = vector.load %arg2[%c0_0, %c0_1] : memref<8x128xf32, #tpu.memory_space<vmem>>, vector<8x128xf32>
    %77 = vector.broadcast %0 : f32 to vector<8x128xf32>
    %78 = arith.mulf %76, %77 : vector<8x128xf32>
    %79 = vector.broadcast %5 : f32 to vector<8x128xf32>
    %80 = arith.addf %78, %79 : vector<8x128xf32>
    %cst = arith.constant 0.000000e+00 : f32
    %81 = vector.broadcast %cst : f32 to vector<8x128xf32>
    %82 = arith.maximumf %80, %81 : vector<8x128xf32>
    %83 = vector.broadcast %1 : f32 to vector<8x128xf32>
    %84 = arith.mulf %76, %83 : vector<8x128xf32>
    %85 = vector.broadcast %6 : f32 to vector<8x128xf32>
    %86 = arith.addf %84, %85 : vector<8x128xf32>
    %cst_2 = arith.constant 0.000000e+00 : f32
    %87 = vector.broadcast %cst_2 : f32 to vector<8x128xf32>
    %88 = arith.maximumf %86, %87 : vector<8x128xf32>
    %89 = vector.broadcast %2 : f32 to vector<8x128xf32>
    %90 = arith.mulf %76, %89 : vector<8x128xf32>
    %91 = vector.broadcast %7 : f32 to vector<8x128xf32>
    %92 = arith.addf %90, %91 : vector<8x128xf32>
    %cst_3 = arith.constant 0.000000e+00 : f32
    %93 = vector.broadcast %cst_3 : f32 to vector<8x128xf32>
    %94 = arith.maximumf %92, %93 : vector<8x128xf32>
    %95 = vector.broadcast %3 : f32 to vector<8x128xf32>
    %96 = arith.mulf %76, %95 : vector<8x128xf32>
    %97 = vector.broadcast %8 : f32 to vector<8x128xf32>
    %98 = arith.addf %96, %97 : vector<8x128xf32>
    %cst_4 = arith.constant 0.000000e+00 : f32
    %99 = vector.broadcast %cst_4 : f32 to vector<8x128xf32>
    %100 = arith.maximumf %98, %99 : vector<8x128xf32>
    %101 = vector.broadcast %4 : f32 to vector<8x128xf32>
    %102 = arith.mulf %76, %101 : vector<8x128xf32>
    %103 = vector.broadcast %9 : f32 to vector<8x128xf32>
    %104 = arith.addf %102, %103 : vector<8x128xf32>
    %cst_5 = arith.constant 0.000000e+00 : f32
    %105 = vector.broadcast %cst_5 : f32 to vector<8x128xf32>
    %106 = arith.maximumf %104, %105 : vector<8x128xf32>
    %107 = vector.broadcast %10 : f32 to vector<8x128xf32>
    %108 = arith.mulf %82, %107 : vector<8x128xf32>
    %109 = vector.broadcast %35 : f32 to vector<8x128xf32>
    %110 = arith.addf %108, %109 : vector<8x128xf32>
    %111 = vector.broadcast %11 : f32 to vector<8x128xf32>
    %112 = arith.mulf %88, %111 : vector<8x128xf32>
    %113 = arith.addf %110, %112 : vector<8x128xf32>
    %114 = vector.broadcast %12 : f32 to vector<8x128xf32>
    %115 = arith.mulf %94, %114 : vector<8x128xf32>
    %116 = arith.addf %113, %115 : vector<8x128xf32>
    %117 = vector.broadcast %13 : f32 to vector<8x128xf32>
    %118 = arith.mulf %100, %117 : vector<8x128xf32>
    %119 = arith.addf %116, %118 : vector<8x128xf32>
    %120 = vector.broadcast %14 : f32 to vector<8x128xf32>
    %121 = arith.mulf %106, %120 : vector<8x128xf32>
    %122 = arith.addf %119, %121 : vector<8x128xf32>
    %cst_6 = arith.constant 0.000000e+00 : f32
    %123 = vector.broadcast %cst_6 : f32 to vector<8x128xf32>
    %124 = arith.maximumf %122, %123 : vector<8x128xf32>
    %125 = vector.broadcast %15 : f32 to vector<8x128xf32>
    %126 = arith.mulf %82, %125 : vector<8x128xf32>
    %127 = vector.broadcast %36 : f32 to vector<8x128xf32>
    %128 = arith.addf %126, %127 : vector<8x128xf32>
    %129 = vector.broadcast %16 : f32 to vector<8x128xf32>
    %130 = arith.mulf %88, %129 : vector<8x128xf32>
    %131 = arith.addf %128, %130 : vector<8x128xf32>
    %132 = vector.broadcast %17 : f32 to vector<8x128xf32>
    %133 = arith.mulf %94, %132 : vector<8x128xf32>
    %134 = arith.addf %131, %133 : vector<8x128xf32>
    %135 = vector.broadcast %18 : f32 to vector<8x128xf32>
    %136 = arith.mulf %100, %135 : vector<8x128xf32>
    %137 = arith.addf %134, %136 : vector<8x128xf32>
    %138 = vector.broadcast %19 : f32 to vector<8x128xf32>
    %139 = arith.mulf %106, %138 : vector<8x128xf32>
    %140 = arith.addf %137, %139 : vector<8x128xf32>
    %cst_7 = arith.constant 0.000000e+00 : f32
    %141 = vector.broadcast %cst_7 : f32 to vector<8x128xf32>
    %142 = arith.maximumf %140, %141 : vector<8x128xf32>
    %143 = vector.broadcast %20 : f32 to vector<8x128xf32>
    %144 = arith.mulf %82, %143 : vector<8x128xf32>
    %145 = vector.broadcast %37 : f32 to vector<8x128xf32>
    %146 = arith.addf %144, %145 : vector<8x128xf32>
    %147 = vector.broadcast %21 : f32 to vector<8x128xf32>
    %148 = arith.mulf %88, %147 : vector<8x128xf32>
    %149 = arith.addf %146, %148 : vector<8x128xf32>
    %150 = vector.broadcast %22 : f32 to vector<8x128xf32>
    %151 = arith.mulf %94, %150 : vector<8x128xf32>
    %152 = arith.addf %149, %151 : vector<8x128xf32>
    %153 = vector.broadcast %23 : f32 to vector<8x128xf32>
    %154 = arith.mulf %100, %153 : vector<8x128xf32>
    %155 = arith.addf %152, %154 : vector<8x128xf32>
    %156 = vector.broadcast %24 : f32 to vector<8x128xf32>
    %157 = arith.mulf %106, %156 : vector<8x128xf32>
    %158 = arith.addf %155, %157 : vector<8x128xf32>
    %cst_8 = arith.constant 0.000000e+00 : f32
    %159 = vector.broadcast %cst_8 : f32 to vector<8x128xf32>
    %160 = arith.maximumf %158, %159 : vector<8x128xf32>
    %161 = vector.broadcast %25 : f32 to vector<8x128xf32>
    %162 = arith.mulf %82, %161 : vector<8x128xf32>
    %163 = vector.broadcast %38 : f32 to vector<8x128xf32>
    %164 = arith.addf %162, %163 : vector<8x128xf32>
    %165 = vector.broadcast %26 : f32 to vector<8x128xf32>
    %166 = arith.mulf %88, %165 : vector<8x128xf32>
    %167 = arith.addf %164, %166 : vector<8x128xf32>
    %168 = vector.broadcast %27 : f32 to vector<8x128xf32>
    %169 = arith.mulf %94, %168 : vector<8x128xf32>
    %170 = arith.addf %167, %169 : vector<8x128xf32>
    %171 = vector.broadcast %28 : f32 to vector<8x128xf32>
    %172 = arith.mulf %100, %171 : vector<8x128xf32>
    %173 = arith.addf %170, %172 : vector<8x128xf32>
    %174 = vector.broadcast %29 : f32 to vector<8x128xf32>
    %175 = arith.mulf %106, %174 : vector<8x128xf32>
    %176 = arith.addf %173, %175 : vector<8x128xf32>
    %cst_9 = arith.constant 0.000000e+00 : f32
    %177 = vector.broadcast %cst_9 : f32 to vector<8x128xf32>
    %178 = arith.maximumf %176, %177 : vector<8x128xf32>
    %179 = vector.broadcast %30 : f32 to vector<8x128xf32>
    %180 = arith.mulf %82, %179 : vector<8x128xf32>
    %181 = vector.broadcast %39 : f32 to vector<8x128xf32>
    %182 = arith.addf %180, %181 : vector<8x128xf32>
    %183 = vector.broadcast %31 : f32 to vector<8x128xf32>
    %184 = arith.mulf %88, %183 : vector<8x128xf32>
    %185 = arith.addf %182, %184 : vector<8x128xf32>
    %186 = vector.broadcast %32 : f32 to vector<8x128xf32>
    %187 = arith.mulf %94, %186 : vector<8x128xf32>
    %188 = arith.addf %185, %187 : vector<8x128xf32>
    %189 = vector.broadcast %33 : f32 to vector<8x128xf32>
    %190 = arith.mulf %100, %189 : vector<8x128xf32>
    %191 = arith.addf %188, %190 : vector<8x128xf32>
    %192 = vector.broadcast %34 : f32 to vector<8x128xf32>
    %193 = arith.mulf %106, %192 : vector<8x128xf32>
    %194 = arith.addf %191, %193 : vector<8x128xf32>
    %cst_10 = arith.constant 0.000000e+00 : f32
    %195 = vector.broadcast %cst_10 : f32 to vector<8x128xf32>
    %196 = arith.maximumf %194, %195 : vector<8x128xf32>
    %197 = vector.broadcast %40 : f32 to vector<8x128xf32>
    %198 = arith.mulf %124, %197 : vector<8x128xf32>
    %199 = vector.broadcast %65 : f32 to vector<8x128xf32>
    %200 = arith.addf %198, %199 : vector<8x128xf32>
    %201 = vector.broadcast %41 : f32 to vector<8x128xf32>
    %202 = arith.mulf %142, %201 : vector<8x128xf32>
    %203 = arith.addf %200, %202 : vector<8x128xf32>
    %204 = vector.broadcast %42 : f32 to vector<8x128xf32>
    %205 = arith.mulf %160, %204 : vector<8x128xf32>
    %206 = arith.addf %203, %205 : vector<8x128xf32>
    %207 = vector.broadcast %43 : f32 to vector<8x128xf32>
    %208 = arith.mulf %178, %207 : vector<8x128xf32>
    %209 = arith.addf %206, %208 : vector<8x128xf32>
    %210 = vector.broadcast %44 : f32 to vector<8x128xf32>
    %211 = arith.mulf %196, %210 : vector<8x128xf32>
    %212 = arith.addf %209, %211 : vector<8x128xf32>
    %cst_11 = arith.constant 0.000000e+00 : f32
    %213 = vector.broadcast %cst_11 : f32 to vector<8x128xf32>
    %214 = arith.maximumf %212, %213 : vector<8x128xf32>
    %215 = vector.broadcast %45 : f32 to vector<8x128xf32>
    %216 = arith.mulf %124, %215 : vector<8x128xf32>
    %217 = vector.broadcast %66 : f32 to vector<8x128xf32>
    %218 = arith.addf %216, %217 : vector<8x128xf32>
    %219 = vector.broadcast %46 : f32 to vector<8x128xf32>
    %220 = arith.mulf %142, %219 : vector<8x128xf32>
    %221 = arith.addf %218, %220 : vector<8x128xf32>
    %222 = vector.broadcast %47 : f32 to vector<8x128xf32>
    %223 = arith.mulf %160, %222 : vector<8x128xf32>
    %224 = arith.addf %221, %223 : vector<8x128xf32>
    %225 = vector.broadcast %48 : f32 to vector<8x128xf32>
    %226 = arith.mulf %178, %225 : vector<8x128xf32>
    %227 = arith.addf %224, %226 : vector<8x128xf32>
    %228 = vector.broadcast %49 : f32 to vector<8x128xf32>
    %229 = arith.mulf %196, %228 : vector<8x128xf32>
    %230 = arith.addf %227, %229 : vector<8x128xf32>
    %cst_12 = arith.constant 0.000000e+00 : f32
    %231 = vector.broadcast %cst_12 : f32 to vector<8x128xf32>
    %232 = arith.maximumf %230, %231 : vector<8x128xf32>
    %233 = vector.broadcast %50 : f32 to vector<8x128xf32>
    %234 = arith.mulf %124, %233 : vector<8x128xf32>
    %235 = vector.broadcast %67 : f32 to vector<8x128xf32>
    %236 = arith.addf %234, %235 : vector<8x128xf32>
    %237 = vector.broadcast %51 : f32 to vector<8x128xf32>
    %238 = arith.mulf %142, %237 : vector<8x128xf32>
    %239 = arith.addf %236, %238 : vector<8x128xf32>
    %240 = vector.broadcast %52 : f32 to vector<8x128xf32>
    %241 = arith.mulf %160, %240 : vector<8x128xf32>
    %242 = arith.addf %239, %241 : vector<8x128xf32>
    %243 = vector.broadcast %53 : f32 to vector<8x128xf32>
    %244 = arith.mulf %178, %243 : vector<8x128xf32>
    %245 = arith.addf %242, %244 : vector<8x128xf32>
    %246 = vector.broadcast %54 : f32 to vector<8x128xf32>
    %247 = arith.mulf %196, %246 : vector<8x128xf32>
    %248 = arith.addf %245, %247 : vector<8x128xf32>
    %cst_13 = arith.constant 0.000000e+00 : f32
    %249 = vector.broadcast %cst_13 : f32 to vector<8x128xf32>
    %250 = arith.maximumf %248, %249 : vector<8x128xf32>
    %251 = vector.broadcast %55 : f32 to vector<8x128xf32>
    %252 = arith.mulf %124, %251 : vector<8x128xf32>
    %253 = vector.broadcast %68 : f32 to vector<8x128xf32>
    %254 = arith.addf %252, %253 : vector<8x128xf32>
    %255 = vector.broadcast %56 : f32 to vector<8x128xf32>
    %256 = arith.mulf %142, %255 : vector<8x128xf32>
    %257 = arith.addf %254, %256 : vector<8x128xf32>
    %258 = vector.broadcast %57 : f32 to vector<8x128xf32>
    %259 = arith.mulf %160, %258 : vector<8x128xf32>
    %260 = arith.addf %257, %259 : vector<8x128xf32>
    %261 = vector.broadcast %58 : f32 to vector<8x128xf32>
    %262 = arith.mulf %178, %261 : vector<8x128xf32>
    %263 = arith.addf %260, %262 : vector<8x128xf32>
    %264 = vector.broadcast %59 : f32 to vector<8x128xf32>
    %265 = arith.mulf %196, %264 : vector<8x128xf32>
    %266 = arith.addf %263, %265 : vector<8x128xf32>
    %cst_14 = arith.constant 0.000000e+00 : f32
    %267 = vector.broadcast %cst_14 : f32 to vector<8x128xf32>
    %268 = arith.maximumf %266, %267 : vector<8x128xf32>
    %269 = vector.broadcast %60 : f32 to vector<8x128xf32>
    %270 = arith.mulf %124, %269 : vector<8x128xf32>
    %271 = vector.broadcast %69 : f32 to vector<8x128xf32>
    %272 = arith.addf %270, %271 : vector<8x128xf32>
    %273 = vector.broadcast %61 : f32 to vector<8x128xf32>
    %274 = arith.mulf %142, %273 : vector<8x128xf32>
    %275 = arith.addf %272, %274 : vector<8x128xf32>
    %276 = vector.broadcast %62 : f32 to vector<8x128xf32>
    %277 = arith.mulf %160, %276 : vector<8x128xf32>
    %278 = arith.addf %275, %277 : vector<8x128xf32>
    %279 = vector.broadcast %63 : f32 to vector<8x128xf32>
    %280 = arith.mulf %178, %279 : vector<8x128xf32>
    %281 = arith.addf %278, %280 : vector<8x128xf32>
    %282 = vector.broadcast %64 : f32 to vector<8x128xf32>
    %283 = arith.mulf %196, %282 : vector<8x128xf32>
    %284 = arith.addf %281, %283 : vector<8x128xf32>
    %cst_15 = arith.constant 0.000000e+00 : f32
    %285 = vector.broadcast %cst_15 : f32 to vector<8x128xf32>
    %286 = arith.maximumf %284, %285 : vector<8x128xf32>
    %287 = vector.broadcast %70 : f32 to vector<8x128xf32>
    %288 = arith.mulf %214, %287 : vector<8x128xf32>
    %289 = vector.broadcast %75 : f32 to vector<8x128xf32>
    %290 = arith.addf %288, %289 : vector<8x128xf32>
    %291 = vector.broadcast %71 : f32 to vector<8x128xf32>
    %292 = arith.mulf %232, %291 : vector<8x128xf32>
    %293 = arith.addf %290, %292 : vector<8x128xf32>
    %294 = vector.broadcast %72 : f32 to vector<8x128xf32>
    %295 = arith.mulf %250, %294 : vector<8x128xf32>
    %296 = arith.addf %293, %295 : vector<8x128xf32>
    %297 = vector.broadcast %73 : f32 to vector<8x128xf32>
    %298 = arith.mulf %268, %297 : vector<8x128xf32>
    %299 = arith.addf %296, %298 : vector<8x128xf32>
    %300 = vector.broadcast %74 : f32 to vector<8x128xf32>
    %301 = arith.mulf %286, %300 : vector<8x128xf32>
    %302 = arith.addf %299, %301 : vector<8x128xf32>
    %c0_16 = arith.constant 0 : index
    %c0_17 = arith.constant 0 : index
    %303 = vector.load %arg3[%c0_16, %c0_17] : memref<8x128xf32, #tpu.memory_space<vmem>>, vector<8x128xf32>
    tpu.vector_store %arg3[%c0_16, %c0_17], %302 {strides = array<i32>} : memref<8x128xf32, #tpu.memory_space<vmem>>, vector<8x128xf32>,
    return
  }
  func.func @transform_0(%arg0: i32) -> i32 {
    %c0_i32 = arith.constant 0 : i32
    %c0_i32_0 = arith.constant 0 : i32
    return %c0_i32 : i32
  }
  func.func @transform_1(%arg0: i32) -> (i32, i32) {
    %c0_i32 = arith.constant 0 : i32
    %c0_i32_0 = arith.constant 0 : i32
    return %arg0, %c0_i32 : i32, i32
  }
  func.func @transform_2(%arg0: i32) -> (i32, i32) {
    %c0_i32 = arith.constant 0 : i32
    %c0_i32_0 = arith.constant 0 : i32
    return %arg0, %c0_i32 : i32, i32
  }
}

</mosaic_0001>

<bundles_post_ra>
// kernel: tpu_custom_call.1
= control target key start
LH: loop header
LB: loop body
LE: loop exit
PB: predicated region body
PF: predicated region fallthrough
CT: control target
= control target key end

     0   :  { %s1342_s0 = inlined_call_operand.hbm [shape: f32[76], index: 0, kind: input, shape index: {}]   ;;  %s1343_s1 = inlined_call_operand.hbm [shape: f32[10,128], index: 1, kind: input, shape index: {}]   ;;  %s1344_s2 = inlined_call_operand.hbm [shape: f32[10,128], index: 2, kind: output, shape index: {}]  }
   0x1   :  { %1349 = sst [smem:[#allocation11_spill]] %s1342_s0 }
   0x2   :  { %7 = vsyncpa [#allocation5], 0 }
   0x3   :  { %8 = vsyncpa [#allocation3], 0 }
   0x4   :  { %10 = vsyncpa [#allocation3 + $0x1], 0 }
   0x5   :  { %11 = vsyncpa [#allocation4], 0 }
   0x6   :  { %13 = vsyncpa [#allocation4 + $0x1], 0  ;;  %s835_s9 = smov 0   ;;  %s837_s10 = smov 0  }
   0x7   :  { %s839_s11 = smov 0   ;;  %s841_s12 = smov 0  }
   0x8 LB: > { %s856_s13 = sadd.s32 4294967295, %s815_s12   ;;  %s556_s14 = sadd.s32 4294967294, %s815_s12   ;;  %s815_s12 = sphi %s841_s12, %s1369_s12   ;;  %s811_s11 = sphi %s839_s11, %s1368_s11   ;;  %s807_s10 = sphi %s837_s10, %s1367_s10   ;;  %s803_s9 = sphi %s835_s9, %s1366_s9  }
   0x9   : > { %p60_p0 = scmp.ne.s32.totalorder %s807_s10, %s803_s9  ;;  %p1345_p1 = scmp.eq.s32.totalorder %s856_s13, 0 }
   0xa   : > { %p90_p3 = scmp.eq.s32.totalorder %s556_s14, 1  ;;  %p557_p5 = scmp.ge.s32.totalorder %s815_s12, 1 }
   0xb   : > { %p865_p4 = por %p1345_p1, %p60_p0  ;;  %p97_p7 = scmp.lt.s32.totalorder %s815_s12, 3 }
   0xc   : > { %p870_p6 = por %p90_p3, %p60_p0  ;;  %s881_s18 = sadd.s32 1, %s815_s12  }
   0xd   : > { %s1350_s15 = scalar_select %p865_p4, 1, 0 }
   0xe   : > { %s1351_s16 = scalar_select %p870_p6, 1, 0 }
   0xf   : > { %p875_p8 = pnand %p557_p5, %p97_p7  ;;  %s44_s19 = ssub.s32 %s815_s12, %s881_s18 }
  0x10   : > { %s47_s20 = sadd.s32 1, %s811_s11  ;;  %p894_p12 = scmp.eq.s32.totalorder %s44_s19, 0 }
  0x11   : > { %p653_p10 = pneg %p875_p8  ;;  %p54_p13 = scmp.ne.s32.totalorder %s811_s11, %s807_s10 }
  0x12   : > { %p55_p0 = scmp.eq.s32.totalorder %s815_s12, 0  ;;  %p666_p3 = scmp.lt.s32.totalorder %s815_s12, 2 }
  0x13   : > { %p890_p11 = pnand %p653_p10, %p1345_p1  ;;  %s1355_s0 = sld [smem:[#allocation11_spill]] }
  0x15   : > { %p704_p7 = pneg %p890_p11 }
  0x19   : > { %s702_s25 = scalar_lea.hbm %s1355_s0, 16 }
  0x1a   : > { %p703_p5 = scmp.ne.s32.totalorder %s1355_s0, %s702_s25  ;;  %p709_p1 = scmp.lt.u32.totalorder %s702_s25, %s1355_s0 }
  0x1c   : > { %p705_p10 = pnand %p704_p7, %p703_p5 }
  0x1e   : > { %p706_p9 = pneg %p705_p10 }
  0x20   : > { %p711_p2 = pnand %p709_p1, %p706_p9 }
  0x22   : > { %714 = shalt.err (!%p711_p2)
}
  0x23   : > { %s817_s30 = smov [#allocation2]   ;;  %p56_p1 = por %p55_p0, %p54_p13 }
  0x24   : > { %656 = dma.hbm_to_smem (!%p890_p11), %s1355_s0, 16, %s817_s30, [#allocation5]  }
  0x25   : > { %s921_s5 = scalar_select %p894_p12, %s811_s11, %s47_s20  }
  0x26   : > { %p1356_p2 = scmp.eq.s32.totalorder %s856_s13, 1  ;;  %s119_s7 = sand.u32 1, %s811_s11  }
  0x27   : > { %s561_s8 = sshll.u32 %s815_s12, 7  ;;  %s560_s14 = sshll.u32 %s119_s7, 3 }
  0x28   : > { %p933_p9 = por %p1356_p2, %p54_p13  ;;  %s942_s23 = scalar_lea.hbm %s1343_s1, %s561_s8 }
  0x29   : > { %s123_s20 = scalar_lea.vmem [#allocation6], %s560_s14  ;;  %p946_p11 = pnand %p666_p3, %p56_p1 }
  0x2a   : > { %s1357_s6 = scalar_select %p933_p9, 1, 0 }
  0x2b   : > { %s130_s22 = sshll.u32 %s123_s20, 4  ;;  %s120_s25 = scalar_lea.sflag [#allocation3], %s119_s7  ;;  %s950_s22 = int_to_ptr.vmem [resolvable:$true] %s130_s22 }
  0x2c   : > { %s715_s26 = scalar_lea.hbm %s942_s23, 128  ;;  %p717_p13 = pneg %p946_p11 }
  0x2d   : > { %p716_p12 = scmp.ne.s32.totalorder %s942_s23, %s715_s26  ;;  %s720_s29 = scalar_lea.hbm %s1343_s1, 256 }
  0x2e   : > { %p721_p3 = scmp.lt.u32.totalorder %s942_s23, %s1343_s1  ;;  %p722_p7 = scmp.lt.u32.totalorder %s720_s29, %s715_s26 }
  0x2f   : > { %p718_p0 = pnand %p717_p13, %p716_p12  ;;  %p724_p1 = scmp.lt.u32.totalorder %s715_s26, %s942_s23 }
  0x30   : > { %p723_p10 = por %p722_p7, %p721_p3 }
  0x31   : > { %p719_p5 = pneg %p718_p0 }
  0x32   : > { %p725_p2 = por %p724_p1, %p723_p10 }
  0x34   : > { %p726_p6 = pnand %p725_p2, %p719_p5 }
  0x36   : > { %729 = shalt.err (!%p726_p6)
}
  0x37   : > { %s730_s4 = scalar_lea.vmem %s950_s22, 128  ;;  %s818_s7 = smov [#allocation6]  }
  0x38   : > { %p731_p12 = scmp.ne.s32.totalorder %s950_s22, %s730_s4  ;;  %s735_s8 = sshll.u32 %s818_s7, 4  ;;  %s736_s8 = int_to_ptr.vmem [resolvable:$false] %s735_s8 }
  0x39   : > { %s737_s14 = scalar_lea.vmem %s736_s8, 256  ;;  %p738_p4 = scmp.lt.s32.totalorder %s950_s22, %s736_s8 }
  0x3a   : > { %p733_p0 = pnand %p731_p12, %p717_p13  ;;  %p739_p3 = scmp.lt.s32.totalorder %s737_s14, %s730_s4 }
  0x3c   : > { %p734_p9 = pneg %p733_p0  ;;  %p740_p7 = por %p739_p3, %p738_p4 }
  0x3e   : > { %p741_p10 = pnand %p740_p7, %p734_p9 }
  0x40   : > { %744 = shalt.err (!%p741_p10)
}
  0x41   : > { %660 = dma.hbm_to_vmem [thread:$0]  (!%p946_p11), %s942_s23, 128, %s950_s22, %s120_s25  }
  0x42   : > { %139 = sbr.rel (%p875_p8) target bundleno = 162 (0xa2), region = 28  ;;  %p1359_p6 = scmp.eq.s32.totalorder (!%p875_p8), %s856_s13, 0 }
  0x49   : > { %790 = dma.done.wait (%p1359_p6), [#allocation5], 16   ;;  %p1360_p13 = pmov %p1359_p6 }
  0x4a   : > { %s984_s19 = sand.u32 1, %s807_s10   ;;  %p1361_p4 = scmp.ne.s32.totalorder %s1350_s15, 0 }
  0x4b   : > { %792 = vsyncadd (%p1360_p13), [#allocation5], 4294967280  ;;  %s1348_s21 = sshll.u32 %s984_s19, 3  ;;  %s146_s20 = scalar_lea.sflag [#allocation3], %s984_s19 }
  0x4c   : > { %s149_s23 = scalar_lea.vmem [#allocation6], %s1348_s21 }
  0x4d   : > { %794 = dma.done.wait (%p1361_p4), %s146_s20, 128  }
  0x4e   : > { %796 = vsyncadd (%p1361_p4), %s146_s20, 4294967168 }
  0x4f   : > { %154 = sfence }
  0x50   : > { %s171_s17 = sld [smem:[#allocation2]]  ;;  %s566_s22 = sld [smem:[#allocation2 + $0x1]]  ;;  %v247_v0 = vld [vmem:[%s149_s23] sm:$0xff] }
  0x51   : > { %s567_s24 = sld [smem:[#allocation2 + $0x2]]  ;;  %s568_s25 = sld [smem:[#allocation2 + $0x3]] }
  0x52   : > { %s569_s26 = sld [smem:[#allocation2 + $0x4]]  ;;  %s570_s27 = sld [smem:[#allocation2 + $0x5]] }
  0x53   : > { %s571_s28 = sld [smem:[#allocation2 + $0x6]]  ;;  %s994_s29 = sld [smem:[#allocation2 + $0x7]] }
  0x54   : > { %s996_s30 = sld [smem:[#allocation2 + $0x8]]  ;;  %s998_s3 = sld [smem:[#allocation2 + $0x9]] }
  0x55   : > { %s1000_s4 = sld [smem:[#allocation2 + $0xa]]  ;;  %s1002_s7 = sld [smem:[#allocation2 + $0xb]] }
  0x56   : > { %s1004_s15 = sld [smem:[#allocation2 + $0xc]]  ;;  %v248_v1 = vstv %s171_s17  ;;  %s1006_s8 = sld [smem:[#allocation2 + $0xd]]  ;;  %v253_v3 = vstv %s566_s22 }
  0x57   : > { %s1008_s14 = sld [smem:[#allocation2 + $0xe]]  ;;  %v249_v2 = vmul.f32 %v248_v1, %v247_v0  ;;  %v258_v4 = vstv %s567_s24  ;;  %s1010_s20 = sld [smem:[#allocation2 + $0xf]]  ;;  %v254_v5 = vmul.f32 %v253_v3, %v247_v0  ;;  %v263_v7 = vstv %s568_s25 }
  0x58   : > { %s1012_s23 = sld [smem:[#allocation2 + $0x10]]  ;;  %v259_v6 = vmul.f32 %v258_v4, %v247_v0  ;;  %v268_v8 = vstv %s569_s26  ;;  %s1014_s21 = sld [smem:[#allocation2 + $0x11]]  ;;  %v250_v9 = vstv %s570_s27  ;;  %v264_v11 = vmul.f32 %v263_v7, %v247_v0 }
  0x59   : > { %s1016_s17 = sld [smem:[#allocation2 + $0x12]]  ;;  %v255_v10 = vstv %s571_s28  ;;  %v269_v12 = vmul.f32 %v268_v8, %v247_v0  ;;  %s1018_s22 = sld [smem:[#allocation2 + $0x13]]  ;;  %v251_v13 = vadd.f32 %v250_v9, %v249_v2  ;;  %v260_v15 = vstv %s994_s29 }
  0x5a   : > { %s1020_s24 = sld [smem:[#allocation2 + $0x14]]  ;;  %v256_v14 = vadd.f32 %v255_v10, %v254_v5  ;;  %v265_v16 = vstv %s996_s30  ;;  %s1024_s25 = sld [smem:[#allocation2 + $0x15]]  ;;  %v261_v17 = vadd.f32 %v260_v15, %v259_v6  ;;  %v270_v19 = vstv %s998_s3 }
  0x5b   : > { %s1026_s26 = sld [smem:[#allocation2 + $0x16]]  ;;  %v266_v18 = vadd.f32 %v265_v16, %v264_v11  ;;  %v273_v20 = vstv %s1000_s4  ;;  %s1030_s27 = sld [smem:[#allocation2 + $0x17]]  ;;  %v1034_v21 = vmax.f32 %v251_v13, 0.0  ;;  %v271_v23 = vadd.f32 %v270_v19, %v269_v12 }
  0x5c   : > { %s1032_s28 = sld [smem:[#allocation2 + $0x18]]  ;;  %v1036_v22 = vmax.f32 %v256_v14, 0.0  ;;  %v277_v24 = vstv %s1002_s7  ;;  %s1039_s29 = sld [smem:[#allocation2 + $0x19]]  ;;  %v1043_v25 = vmax.f32 %v261_v17, 0.0  ;;  %v280_v27 = vstv %s1004_s15 }
  0x5d   : > { %s1041_s30 = sld [smem:[#allocation2 + $0x1a]]  ;;  %v1045_v26 = vmax.f32 %v266_v18, 0.0  ;;  %v283_v28 = vstv %s1006_s8  ;;  %s1049_s3 = sld [smem:[#allocation2 + $0x1b]]  ;;  %v1053_v29 = vmax.f32 %v271_v23, 0.0  ;;  %v274_v30 = vmul.f32 %v273_v20, %v1034_v21 }
  0x5e   : > { %s1051_s4 = sld [smem:[#allocation2 + $0x1c]]  ;;  %v1057_v31 = vmul.f32 %v277_v24, %v1036_v22  ;;  %v286_v32 = vstv %s1008_s14  ;;  %s1060_s7 = sld [smem:[#allocation2 + $0x1d]]  ;;  %v1065_v33 = vmul.f32 %v280_v27, %v1043_v25  ;;  %v290_v35 = vstv %s1010_s20 }
  0x5f   : > { %s1062_s15 = sld [smem:[#allocation2 + $0x1e]]  ;;  %v1068_v34 = vmul.f32 %v283_v28, %v1045_v26  ;;  %v294_v36 = vstv %s1012_s23  ;;  %s1072_s8 = sld [smem:[#allocation2 + $0x1f]]  ;;  %v1077_v37 = vmul.f32 %v286_v32, %v1053_v29  ;;  %v291_v38 = vmul.f32 %v290_v35, %v1034_v21 }
  0x60   : > { %s1074_s0 = sld [smem:[#allocation2 + $0x20]]  ;;  %v295_v39 = vmul.f32 %v294_v36, %v1036_v22  ;;  %v297_v40 = vstv %s1014_s21  ;;  %s1082_s14 = sld [smem:[#allocation2 + $0x21]]  ;;  %v300_v42 = vstv %s1016_s17  ;;  %v303_v43 = vstv %s1018_s22 }
  0x61   : > { %v1085_v41 = vmul.f32 %v297_v40, %v1043_v25  ;;  %v307_v44 = vstv %s1020_s24  ;;  %s1090_s20 = sld [smem:[#allocation2 + $0x23]]  ;;  %s1092_s23 = sld [smem:[#allocation2 + $0x24]]  ;;  %v1095_v45 = vmul.f32 %v300_v42, %v1045_v26  ;;  %v1098_v46 = vmul.f32 %v303_v43, %v1053_v29 }
  0x62   : > { %v308_v47 = vmul.f32 %v307_v44, %v1034_v21  ;;  %v311_v48 = vstv %s1024_s25  ;;  %s1102_s21 = sld [smem:[#allocation2 + $0x25]]  ;;  %s1104_s17 = sld [smem:[#allocation2 + $0x26]]  ;;  %v314_v50 = vstv %s1026_s26  ;;  %v317_v51 = vstv %s1030_s27 }
  0x63   : > { %v312_v49 = vmul.f32 %v311_v48, %v1036_v22  ;;  %v320_v52 = vstv %s1032_s28  ;;  %s1110_s22 = sld [smem:[#allocation2 + $0x22]]  ;;  %s1112_s24 = sld [smem:[#allocation2 + $0x27]]  ;;  %v315_v53 = vmul.f32 %v314_v50, %v1043_v25  ;;  %v318_v54 = vmul.f32 %v317_v51, %v1045_v26 }
  0x64   : > { %v1117_v55 = vmul.f32 %v320_v52, %v1053_v29  ;;  %v324_v56 = vstv %s1039_s29  ;;  %v328_v58 = vstv %s1041_s30  ;;  %v331_v59 = vstv %s1049_s3  ;;  %s1124_s25 = sld [smem:[#allocation2 + $0x28]]  ;;  %s1126_s26 = sld [smem:[#allocation2 + $0x29]] }
  0x65   : > { %v325_v57 = vmul.f32 %v324_v56, %v1034_v21  ;;  %v334_v60 = vstv %s1051_s4  ;;  %v329_v61 = vmul.f32 %v328_v58, %v1036_v22  ;;  %v332_v62 = vmul.f32 %v331_v59, %v1043_v25  ;;  %s1132_s27 = sld [smem:[#allocation2 + $0x2a]]  ;;  %s1138_s28 = sld [smem:[#allocation2 + $0x2b]] }
  0x66   : > { %v335_v63 = vmul.f32 %v334_v60, %v1045_v26  ;;  %v337_v0 = vstv %s1060_s7  ;;  %v341_v2 = vstv %s1062_s15  ;;  %v345_v3 = vstv %s1072_s8  ;;  %s1140_s29 = sld [smem:[#allocation2 + $0x2c]]  ;;  %s1146_s30 = sld [smem:[#allocation2 + $0x2d]] }
  0x67   : > { %v338_v1 = vmul.f32 %v337_v0, %v1053_v29  ;;  %v348_v4 = vstv %s1074_s0  ;;  %v275_v5 = vstv %s1090_s20  ;;  %v292_v6 = vstv %s1092_s23  ;;  %s1150_s3 = sld [smem:[#allocation2 + $0x2e]]  ;;  %s1152_s0 = sld [smem:[#allocation2 + $0x2f]] }
  0x68   : > { %v342_v7 = vmul.f32 %v341_v2, %v1034_v21  ;;  %v346_v8 = vmul.f32 %v345_v3, %v1036_v22  ;;  %v276_v9 = vadd.f32 %v275_v5, %v274_v30  ;;  %v293_v10 = vadd.f32 %v292_v6, %v291_v38  ;;  %s1156_s4 = sld [smem:[#allocation2 + $0x30]]  ;;  %s1160_s7 = sld [smem:[#allocation2 + $0x31]] }
  0x69   : > { %v309_v11 = vstv %s1102_s21  ;;  %v326_v12 = vstv %s1104_s17  ;;  %v343_v15 = vstv %s1112_s24  ;;  %v349_v16 = vmul.f32 %v348_v4, %v1043_v25  ;;  %s1162_s15 = sld [smem:[#allocation2 + $0x32]]  ;;  %s1171_s8 = sld [smem:[#allocation2 + $0x33]] }
  0x6a   : > { %v310_v13 = vadd.f32 %v309_v11, %v308_v47  ;;  %v327_v14 = vadd.f32 %v326_v12, %v325_v57  ;;  %v279_v17 = vadd.f32 %v1057_v31, %v276_v9  ;;  %v296_v18 = vadd.f32 %v295_v39, %v293_v10  ;;  %s1178_s20 = sld [smem:[#allocation2 + $0x35]]  ;;  %s1182_s23 = sld [smem:[#allocation2 + $0x41]] }
  0x6b   : > { %v344_v19 = vadd.f32 %v343_v15, %v342_v7  ;;  %v351_v20 = vstv %s1082_s14  ;;  %v354_v24 = vstv %s1110_s22  ;;  %v358_v35 = vstv %s1124_s25  ;;  %s1176_s14 = sld [smem:[#allocation2 + $0x34]]  ;;  %s1184_s21 = sld [smem:[#allocation2 + $0x42]] }
  0x6c   : > { %v313_v21 = vadd.f32 %v312_v49, %v310_v13  ;;  %v330_v22 = vadd.f32 %v329_v61, %v327_v14  ;;  %v352_v23 = vmul.f32 %v351_v20, %v1045_v26  ;;  %v282_v25 = vadd.f32 %v1065_v33, %v279_v17  ;;  %s1189_s17 = sld [smem:[#allocation2 + $0x43]]  ;;  %s1194_s22 = sld [smem:[#allocation2 + $0x36]] }
  0x6d   : > { %v299_v27 = vadd.f32 %v1085_v41, %v296_v18  ;;  %v347_v28 = vadd.f32 %v346_v8, %v344_v19  ;;  %v355_v30 = vmul.f32 %v354_v24, %v1053_v29  ;;  %v362_v36 = vstv %s1126_s26  ;;  %s1196_s24 = sld [smem:[#allocation2 + $0x37]]  ;;  %s1203_s25 = sld [smem:[#allocation2 + $0x38]] }
  0x6e   : > { %v316_v31 = vadd.f32 %v315_v53, %v313_v21  ;;  %v333_v32 = vadd.f32 %v332_v62, %v330_v22  ;;  %v285_v38 = vadd.f32 %v1068_v34, %v282_v25  ;;  %v365_v33 = vstv %s1132_s27  ;;  %s1211_s26 = sld [smem:[#allocation2 + $0x39]]  ;;  %s1213_s27 = sld [smem:[#allocation2 + $0x44]] }
  0x6f   : > { %v302_v26 = vadd.f32 %v1095_v45, %v299_v27  ;;  %v350_v39 = vadd.f32 %v349_v16, %v347_v28  ;;  %v368_v41 = vstv %s1138_s28  ;;  %v371_v42 = vstv %s1140_s29  ;;  %s1224_s28 = sld [smem:[#allocation2 + $0x3a]]  ;;  %s1226_s29 = sld [smem:[#allocation2 + $0x3b]] }
  0x70   : > { %v319_v29 = vadd.f32 %v318_v54, %v316_v31  ;;  %v336_v40 = vadd.f32 %v335_v63, %v333_v32  ;;  %v288_v34 = vadd.f32 %v1077_v37, %v285_v38  ;;  %v375_v45 = vstv %s1146_s30  ;;  %s1234_s30 = sld [smem:[#allocation2 + $0x3c]]  ;;  %p1363_p9 = scmp.ne.s32.totalorder %s1357_s6, 0 }
  0x71   : > { %v305_v43 = vadd.f32 %v1098_v46, %v302_v26  ;;  %v353_v44 = vadd.f32 %v352_v23, %v350_v39  ;;  %v379_v49 = vstv %s1150_s3  ;;  %v382_v50 = vstv %s1152_s0  ;;  %s1236_s3 = sld [smem:[#allocation2 + $0x45]] }
  0x72   : > { %v322_v47 = vadd.f32 %v1117_v55, %v319_v29  ;;  %v339_v48 = vadd.f32 %v338_v1, %v336_v40  ;;  %v1198_v51 = vmax.f32 %v288_v34, 0.0  ;;  %v385_v52 = vstv %s1156_s4  ;;  %s1242_s0 = sld [smem:[#allocation2 + $0x3d]]  ;;  %s1245_s4 = sld [smem:[#allocation2 + $0x3e]] }
  0x73   : > { %v1200_v37 = vmax.f32 %v305_v43, 0.0  ;;  %v356_v46 = vadd.f32 %v355_v30, %v353_v44  ;;  %v388_v55 = vstv %s1160_s7  ;;  %v392_v56 = vstv %s1162_s15  ;;  %s1247_s7 = sld [smem:[#allocation2 + $0x3f]]  ;;  %s1254_s15 = sld [smem:[#allocation2 + $0x40]] }
  0x74   : > { %v1205_v53 = vmax.f32 %v322_v47, 0.0  ;;  %v1207_v54 = vmax.f32 %v339_v48, 0.0  ;;  %v359_v58 = vmul.f32 %v358_v35, %v1198_v51  ;;  %v376_v60 = vmul.f32 %v375_v45, %v1198_v51 }
  0x75   : > { %v1215_v57 = vmax.f32 %v356_v46, 0.0  ;;  %v363_v59 = vmul.f32 %v362_v36, %v1200_v37  ;;  %v380_v63 = vmul.f32 %v379_v49, %v1200_v37  ;;  %v360_v1 = vstv %s1182_s23  ;;  %s1267_s23 = sld [smem:[#allocation2 + $0x48]] }
  0x76   : > { %v366_v61 = vmul.f32 %v365_v33, %v1205_v53  ;;  %v369_v62 = vmul.f32 %v368_v41, %v1207_v54  ;;  %v383_v0 = vmul.f32 %v382_v50, %v1205_v53  ;;  %v377_v3 = vstv %s1184_s21  ;;  %s1269_s21 = sld [smem:[#allocation2 + $0x49]] }
  0x77   : > { %v372_v2 = vmul.f32 %v371_v42, %v1215_v57  ;;  %v386_v4 = vmul.f32 %v385_v52, %v1207_v54  ;;  %v361_v5 = vadd.f32 %v360_v1, %v359_v58  ;;  %v378_v6 = vadd.f32 %v377_v3, %v376_v60 }
  0x78   : > { %v389_v7 = vmul.f32 %v388_v55, %v1215_v57  ;;  %v393_v8 = vmul.f32 %v392_v56, %v1198_v51  ;;  %v394_v9 = vstv %s1189_s17  ;;  %v396_v10 = vstv %s1171_s8  ;;  %s1256_s8 = sld [smem:[#allocation2 + $0x46]]  ;;  %s639_s17 = sld [smem:[#allocation2 + $0x4a]] }
  0x79   : > { %v399_v11 = vstv %s1176_s14  ;;  %v402_v12 = vstv %s1178_s20  ;;  %v364_v13 = vadd.f32 %v363_v59, %v361_v5  ;;  %v381_v14 = vadd.f32 %v380_v63, %v378_v6  ;;  %s1262_s14 = sld [smem:[#allocation2 + $0x47]]  ;;  %s1264_s20 = sld [smem:[#allocation2 + $0x4b]] }
  0x7a   : > { %v395_v15 = vadd.f32 %v394_v9, %v393_v8  ;;  %v397_v16 = vmul.f32 %v396_v10, %v1200_v37  ;;  %v400_v17 = vmul.f32 %v399_v11, %v1205_v53  ;;  %v403_v18 = vmul.f32 %v402_v12, %v1207_v54 }
  0x7b   : > { %v405_v19 = vstv %s1194_s22  ;;  %v409_v20 = vstv %s1196_s24  ;;  %v367_v21 = vadd.f32 %v366_v61, %v364_v13  ;;  %v384_v22 = vadd.f32 %v383_v0, %v381_v14  ;;  %s642_s22 = sshll.u32 %s856_s13, 7  ;;  %s1362_s24 = sshll.u32 %s984_s19, 3 }
  0x7c   : > { %v398_v23 = vadd.f32 %v397_v16, %v395_v15  ;;  %v406_v24 = vmul.f32 %v405_v19, %v1215_v57  ;;  %v410_v25 = vmul.f32 %v409_v20, %v1198_v51  ;;  %v411_v27 = vstv %s1213_s27  ;;  %s819_s13 = smov [#allocation7]  }
  0x7d   : > { %v413_v28 = vstv %s1203_s25  ;;  %v416_v30 = vstv %s1211_s26  ;;  %v370_v31 = vadd.f32 %v369_v62, %v367_v21  ;;  %v387_v32 = vadd.f32 %v386_v4, %v384_v22  ;;  %s170_s25 = scalar_lea.vmem [#allocation7], %s1362_s24 }
  0x7e   : > { %v401_v35 = vadd.f32 %v400_v17, %v398_v23  ;;  %v414_v36 = vmul.f32 %v413_v28, %v1200_v37  ;;  %v412_v38 = vadd.f32 %v411_v27, %v410_v25  ;;  %v417_v26 = vmul.f32 %v416_v30, %v1205_v53  ;;  %s474_s26 = sshll.u32 %s170_s25, 4  ;;  %s1300_s26 = int_to_ptr.vmem [resolvable:$true] %s474_s26 }
  0x7f   : > { %v419_v39 = vstv %s1224_s28  ;;  %v422_v33 = vstv %s1226_s29  ;;  %v373_v29 = vadd.f32 %v372_v2, %v370_v31  ;;  %v390_v40 = vadd.f32 %v389_v7, %v387_v32  ;;  %s1298_s29 = scalar_lea.hbm %s1344_s2, %s642_s22 }
  0x80   : > { %v404_v41 = vadd.f32 %v403_v18, %v401_v35  ;;  %v420_v42 = vmul.f32 %v419_v39, %v1207_v54  ;;  %v415_v34 = vadd.f32 %v414_v36, %v412_v38  ;;  %v423_v43 = vmul.f32 %v422_v33, %v1215_v57 }
  0x81   : > { %v426_v44 = vstv %s1234_s30  ;;  %v428_v45 = vstv %s1236_s3  ;;  %v374_v47 = vmax.f32 %v373_v29, 0.0  ;;  %v391_v48 = vmax.f32 %v390_v40, 0.0  ;;  %s461_s30 = scalar_lea.sflag [#allocation4], %s984_s19  ;;  %s745_s3 = scalar_lea.vmem %s1300_s26, 128 }
  0x82   : > { %v407_v49 = vadd.f32 %v406_v24, %v404_v41  ;;  %v427_v50 = vmul.f32 %v426_v44, %v1198_v51  ;;  %v418_v46 = vadd.f32 %v417_v26, %v415_v34  ;;  %v430_v52 = vstv %s1242_s0  ;;  %p746_p8 = scmp.ne.s32.totalorder %s1300_s26, %s745_s3  ;;  %s749_s0 = sshll.u32 %s819_s13, 4  ;;  %s750_s0 = int_to_ptr.vmem [resolvable:$false] %s749_s0 }
  0x83   : > { %v433_v55 = vstv %s1245_s4  ;;  %v436_v56 = vstv %s1247_s7  ;;  %v431_v60 = vmul.f32 %v430_v52, %v1200_v37  ;;  %v439_v0 = vstv %s1254_s15  ;;  %s751_s4 = scalar_lea.vmem %s750_s0, 256  ;;  %p752_p1 = scmp.lt.s32.totalorder %s1300_s26, %s750_s0 }
  0x84   : > { %v408_v58 = vmax.f32 %v407_v49, 0.0  ;;  %v429_v59 = vadd.f32 %v428_v45, %v427_v50  ;;  %v434_v61 = vmul.f32 %v433_v55, %v1205_v53  ;;  %v421_v62 = vadd.f32 %v420_v42, %v418_v46  ;;  %p747_p11 = pnand %p746_p8, %p1363_p9  ;;  %p753_p2 = scmp.lt.s32.totalorder %s751_s4, %s745_s3 }
  0x85   : > { %v437_v63 = vmul.f32 %v436_v56, %v1207_v54  ;;  %v443_v51 = vstv %s1256_s8  ;;  %v440_v2 = vmul.f32 %v439_v0, %v1215_v57  ;;  %v445_v4 = vstv %s1264_s20 }
  0x86   : > { %v432_v1 = vadd.f32 %v431_v60, %v429_v59  ;;  %v444_v3 = vmul.f32 %v443_v51, %v374_v47  ;;  %v424_v5 = vadd.f32 %v423_v43, %v421_v62  ;;  %v447_v6 = vstv %s1262_s14  ;;  %p748_p5 = pneg %p747_p11  ;;  %p754_p12 = por %p753_p2, %p752_p1 }
  0x87   : > { %v450_v7 = vstv %s1267_s23  ;;  %v453_v8 = vstv %s1269_s21  ;;  %v448_v53 = vmul.f32 %v447_v6, %v391_v48  ;;  %v456_v15 = vstv %s639_s17 }
  0x88   : > { %v435_v37 = vadd.f32 %v434_v61, %v432_v1  ;;  %v446_v9 = vadd.f32 %v445_v4, %v444_v3  ;;  %v451_v10 = vmul.f32 %v450_v7, %v408_v58  ;;  %v425_v11 = vmax.f32 %v424_v5, 0.0  ;;  %p755_p0 = pnand %p754_p12, %p748_p5 }
  0x8a   : > { %v438_v12 = vadd.f32 %v437_v63, %v435_v37  ;;  %v449_v54 = vadd.f32 %v448_v53, %v446_v9  ;;  %v454_v13 = vmul.f32 %v453_v8, %v425_v11 }
  0x8c   : > { %v441_v14 = vadd.f32 %v440_v2, %v438_v12  ;;  %v452_v57 = vadd.f32 %v451_v10, %v449_v54 }
  0x8e   : > { %v442_v16 = vmax.f32 %v441_v14, 0.0  ;;  %v455_v17 = vadd.f32 %v454_v13, %v452_v57 }
  0x90   : > { %v457_v18 = vmul.f32 %v456_v15, %v442_v16 }
  0x92   : > { %v458_v19 = vadd.f32 %v457_v18, %v455_v17 }
  0x94   : > { %459 = vst [vmem:[%s170_s25] sm:$0xff] %v458_v19 }
  0x95   : > { %758 = shalt.err (!%p755_p0)
}
  0x96   : > { %s759_s19 = scalar_lea.hbm %s1298_s29, 128  ;;  %s763_s8 = scalar_lea.hbm %s1344_s2, 256 }
  0x97   : > { %p760_p3 = scmp.ne.s32.totalorder %s1298_s29, %s759_s19  ;;  %p764_p6 = scmp.lt.u32.totalorder %s1298_s29, %s1344_s2 }
  0x98   : > { %p765_p13 = scmp.lt.u32.totalorder %s763_s8, %s759_s19  ;;  %p767_p8 = scmp.lt.u32.totalorder %s759_s19, %s1298_s29 }
  0x99   : > { %p761_p7 = pnand %p760_p3, %p1363_p9 }
  0x9a   : > { %p766_p4 = por %p765_p13, %p764_p6 }
  0x9b   : > { %p762_p10 = pneg %p761_p7 }
  0x9c   : > { %p768_p11 = por %p767_p8, %p766_p4 }
  0x9e   : > { %p769_p5 = pnand %p768_p11, %p762_p10 }
  0xa0   : > { %772 = shalt.err (!%p769_p5)
}
  0xa1   : > { %651 = dma.vmem_to_hbm [thread:$0]  (%p1363_p9), %s1300_s26, 128, %s1298_s29, %s461_s30  }
  0xa2 PF: > { %s486_s23 = sand.u32 1, %s803_s9   ;;  %p1364_p1 = scmp.ne.s32.totalorder %s1351_s16, 0 }
  0xa3   : > { %p1365_p2 = scmp.ge.s32.totalorder %s815_s12, 2  ;;  %s487_s21 = scalar_lea.sflag [#allocation4], %s486_s23 }
  0xa5   : > { %p662_p12 = pnand %p1365_p2, %p1364_p1 }
  0xa7   : > { %798 = dma.done.wait (!%p662_p12), %s487_s21, 128  }
  0xa8   : > { %800 = vsyncadd (!%p662_p12), %s487_s21, 4294967168  ;;  %p16_p0 = scmp.ge.s32.totalorder %s881_s18, 4   ;;  %s1366_s9 = smov %s807_s10 }
  0xa9   : > { %s1367_s10 = smov %s811_s11  ;;  %s1368_s11 = smov %s921_s5 }
  0xaa   : > { %s1369_s12 = smov %s881_s18  ;;  %18 = sbr.rel (!%p16_p0) target bundleno = 8 (0x8), region = 78 }
  0xb1   :  { %492 = vsyncpa [#allocation3], 1 }
  0xb2   :  { %494 = vsyncpa [#allocation3 + $0x1], 1 }
  0xb3   :  { %495 = vsyncpa [#allocation4], 1 }
  0xb4   :  { %497 = vsyncpa [#allocation4 + $0x1], 1 }
  0xb5   :  { %498 = vsyncpa [#allocation5], 1 }
  0xb6   :  { %500 = vsyncpa [#allocation5 + $0x1], 1 }

</bundles_post_ra>
